<compile_context>
chip_gen: v5e
topology: v5e:2x2
jax: 0.10.0
libtpu: 0.0.40
codegen_flags: <defaults>
</compile_context>

<pallas_src>
import functools

import jax
import jax.numpy as jnp
from jax.experimental import pallas as pl
from jax.experimental.pallas import tpu as pltpu


def _round_up(x, m):
    return ((x + m - 1) // m) * m


def _encoder_kernel(x_ref, w1_ref, b1_ref, w2_ref, b2_ref, o_ref):
    # x_ref : (tile_n, D)  f32  -> cast to bf16 in-kernel (no extra HBM pass)
    # w1_ref: (D, Hp)      bf16    b1_ref: (1, Hp) f32
    # w2_ref: (Hp, C)      bf16    b2_ref: (1, C)  f32
    # o_ref : (tile_n, C)  true (unpadded) output width -> tiny HBM writeback
    x = x_ref[...].astype(jnp.bfloat16)
    h = jnp.dot(x, w1_ref[...], preferred_element_type=jnp.float32)
    h = jnp.maximum(h + b1_ref[...], 0.0)
    # Layer 2 on the MXU in bf16; accuracy already bounded by bf16 operands upstream.
    y = jnp.dot(h.astype(jnp.bfloat16), w2_ref[...],
                preferred_element_type=jnp.float32)
    o_ref[...] = (y + b2_ref[...]).astype(o_ref.dtype)


def _choose_tile_n(n_rows, requested):
    # Multiple of 16 (bf16 sublane packing), clamped for small inputs; split so
    # the grid has >= 2 steps when N is large (v7x has 2 TensorCores per chip).
    requested = max(16, min(int(requested), _round_up(n_rows, 16)))
    grid_n = max(1, -(-n_rows // requested))
    if grid_n < 2 and n_rows > 2048:
        grid_n = 2
    tile_n = _round_up(-(-n_rows // grid_n), 16)
    return tile_n, grid_n


@functools.partial(jax.jit, static_argnames=("tile_n",))
def parametric_umap_forward(x, w1p, b1p, w2p, b2p, *, tile_n=8192):
    """Fused 2-layer MLP encoder forward.  x: [N, D] -> [N, C]."""
    N, D = x.shape
    Hp = w1p.shape[1]
    C = w2p.shape[1]
    out_dtype = x.dtype

    tn, grid_n = _choose_tile_n(N, tile_n)
    Np = tn * grid_n

    # Row padding only when needed; x keeps its dtype (the bf16 cast happens
    # inside the kernel).  Under jit the pad fuses into the feeding op.
    xin = x if Np == N else jnp.pad(x, ((0, Np - N), (0, 0)))

    # VMEM budget from the actual tile footprint, well below every generation's
    # physical VMEM (v7x has only 64 MiB per TC).
    vmem_need = (2 * tn * D * x.dtype.itemsize      # x tiles, double-buffered
                 + 2 * tn * C * 4                   # out tiles, double-buffered
                 + 2 * (D * Hp + Hp * C) * 2        # bf16 weights
                 + 2 * (Hp + C) * 4)                # f32 biases
    vmem_limit = int(min(48 << 20, max(16 << 20, 2 * vmem_need + (4 << 20))))

    out = pl.pallas_call(
        _encoder_kernel,
        out_shape=jax.ShapeDtypeStruct((Np, C), out_dtype),
        grid_spec=pl.GridSpec(
            grid=(grid_n,),
            in_specs=[
                pl.BlockSpec((tn, D), lambda i: (i, 0)),   # x: tiled over rows
                pl.BlockSpec((D, Hp), lambda i: (0, 0)),   # w1: resident
                pl.BlockSpec((1, Hp), lambda i: (0, 0)),   # b1: resident
                pl.BlockSpec((Hp, C), lambda i: (0, 0)),   # w2: resident
                pl.BlockSpec((1, C), lambda i: (0, 0)),    # b2: resident
            ],
            out_specs=pl.BlockSpec((tn, C), lambda i: (i, 0)),
        ),
        compiler_params=pltpu.CompilerParams(
            dimension_semantics=("parallel",),
            vmem_limit_bytes=vmem_limit,
        ),
    )(xin, w1p, b1p, w2p, b2p)

    return out if Np == N else out[:N]


class ParametricUMAPPallas:
    """JAX/Pallas port of ParametricUMAP's forward pass (encoder only)."""

    # Deterministic a, b for (min_dist=0.1, spread=1.0); unused in forward.
    A = 1.5769434603113077
    B = 0.8950608779109733

    def __init__(self, hidden_dim, enc_hidden=32, n_components=2,
                 n_neighbors=15, negative_sample_rate=5, key=None):
        self.n_neighbors = n_neighbors
        self.n_components = n_components
        self.negative_sample_rate = negative_sample_rate
        k1, k2 = jax.random.split(key)
        H, C = enc_hidden, n_components
        # Deterministic synthetic encoder parameters (scaled normal init), f32 masters.
        self.w1 = jax.random.normal(k1, (hidden_dim, H), jnp.float32) / jnp.sqrt(hidden_dim)
        self.b1 = jnp.zeros((1, H), jnp.float32)
        self.w2 = jax.random.normal(k2, (H, C), jnp.float32) / jnp.sqrt(H)
        self.b2 = jnp.zeros((1, C), jnp.float32)

        # Kernel-ready operands, prepared ONCE: hidden width lane-padded to a
        # multiple of 128 (padded columns/rows are zero -> no effect), weights in
        # bf16 for the MXU, biases kept f32 (added to the f32 accumulator).
        Hp = _round_up(max(H, 128), 128)
        self._w1p = jnp.pad(self.w1, ((0, 0), (0, Hp - H))).astype(jnp.bfloat16)
        self._b1p = jnp.pad(self.b1, ((0, 0), (0, Hp - H))).astype(jnp.float32)
        self._w2p = jnp.pad(self.w2, ((0, Hp - H), (0, 0))).astype(jnp.bfloat16)
        self._b2p = self.b2.astype(jnp.float32)
        # TODO(synk): compute_loss (cdist / topk / smooth_knn_dist / negative sampling)
        # is not part of forward() and is not implemented here.

    def __call__(self, x):
        return parametric_umap_forward(x, self._w1p, self._b1p, self._w2p, self._b2p)


if __name__ == "__main__":
    key = jax.random.PRNGKey(0)
    kx, kp = jax.random.split(key)

    batch, seq, hidden = 2, 8, 32
    N = batch * seq                       # forward input is [batch*seq, hidden_dim]
    x = jax.random.normal(kx, (N, hidden), jnp.float32)

    model = ParametricUMAPPallas(hidden_dim=hidden, enc_hidden=32,
                                 n_components=2, key=kp)
    emb = jax.block_until_ready(model(x))

    assert emb.shape == (N, 2), emb.shape

    # Pure-JAX reference with the same bf16 operand rounding + f32 accumulation.
    xb = x.astype(jnp.bfloat16).astype(jnp.float32)
    w1b = model.w1.astype(jnp.bfloat16).astype(jnp.float32)
    w2b = model.w2.astype(jnp.bfloat16).astype(jnp.float32)
    h_ref = jnp.maximum(xb @ w1b + model.b1, 0.0)
    ref = h_ref.astype(jnp.bfloat16).astype(jnp.float32) @ w2b + model.b2
    assert jnp.allclose(emb, ref, atol=2e-3, rtol=2e-3), float(jnp.max(jnp.abs(emb - ref)))

    # Loose sanity check against the full-f32 reference too.
    ref32 = jnp.maximum(x @ model.w1 + model.b1, 0.0) @ model.w2 + model.b2
    assert jnp.allclose(emb, ref32, atol=5e-2, rtol=5e-2), float(jnp.max(jnp.abs(emb - ref32)))

    print("KERNEL_OK")
</pallas_src>

<mosaic_0001>
module attributes {stable_mosaic.version = 11 : i64} {
  func.func @_encoder_kernel(%arg0: i32, %arg1: memref<16x32xf32, #tpu.memory_space<vmem>>, %arg2: memref<32x128xbf16, #tpu.memory_space<vmem>>, %arg3: memref<1x128xf32, #tpu.memory_space<vmem>>, %arg4: memref<128x2xbf16, #tpu.memory_space<vmem>>, %arg5: memref<1x2xf32, #tpu.memory_space<vmem>>, %arg6: memref<16x2xf32, #tpu.memory_space<vmem>>) attributes {dimension_semantics = [#tpu.dimension_semantics<parallel>], iteration_bounds = array<i64: 1>, scalar_prefetch = 0 : i64, scratch_operands = 0 : i64, tpu.core_type = #tpu.core_type<tc>, window_params = [{transform_indices = @transform_0, window_bounds = array<i64: 16, 32>}, {pipeline_mode = #tpu.pipeline_mode<synchronous>, transform_indices = @transform_1, window_bounds = array<i64: 32, 128>}, {pipeline_mode = #tpu.pipeline_mode<synchronous>, transform_indices = @transform_2, window_bounds = array<i64: 1, 128>}, {pipeline_mode = #tpu.pipeline_mode<synchronous>, transform_indices = @transform_3, window_bounds = array<i64: 128, 2>}, {pipeline_mode = #tpu.pipeline_mode<synchronous>, transform_indices = @transform_4, window_bounds = array<i64: 1, 2>}, {transform_indices = @transform_5, window_bounds = array<i64: 16, 2>}]} {
    %c0 = arith.constant 0 : index
    %c0_0 = arith.constant 0 : index
    %0 = vector.load %arg1[%c0, %c0_0] : memref<16x32xf32, #tpu.memory_space<vmem>>, vector<16x32xf32>
    %1 = arith.truncf %0 : vector<16x32xf32> to vector<16x32xbf16>
    %c0_1 = arith.constant 0 : index
    %c0_2 = arith.constant 0 : index
    %2 = vector.load %arg2[%c0_1, %c0_2] : memref<32x128xbf16, #tpu.memory_space<vmem>>, vector<32x128xbf16>
    %cst = arith.constant dense<0.000000e+00> : vector<16x128xf32>
    %3 = tpu.matmul %1, %2, %cst {dimension_numbers = #tpu.dot_dimension_numbers<[1], [0], [0], [1], [0, 0, 1, 1], [], []>} : vector<16x32xbf16>, vector<32x128xbf16>, vector<16x128xf32> -> vector<16x128xf32>
    %c0_3 = arith.constant 0 : index
    %c0_4 = arith.constant 0 : index
    %4 = vector.load %arg3[%c0_3, %c0_4] : memref<1x128xf32, #tpu.memory_space<vmem>>, vector<1x128xf32>
    %5 = vector.broadcast %4 : vector<1x128xf32> to vector<16x128xf32>
    %6 = arith.addf %3, %5 : vector<16x128xf32>
    %cst_5 = arith.constant 0.000000e+00 : f32
    %7 = vector.broadcast %cst_5 : f32 to vector<16x128xf32>
    %8 = arith.maximumf %6, %7 : vector<16x128xf32>
    %9 = arith.truncf %8 : vector<16x128xf32> to vector<16x128xbf16>
    %c0_6 = arith.constant 0 : index
    %c0_7 = arith.constant 0 : index
    %10 = vector.load %arg4[%c0_6, %c0_7] : memref<128x2xbf16, #tpu.memory_space<vmem>>, vector<128x2xbf16>
    %cst_8 = arith.constant dense<0.000000e+00> : vector<16x2xf32>
    %11 = tpu.matmul %9, %10, %cst_8 {dimension_numbers = #tpu.dot_dimension_numbers<[1], [0], [0], [1], [0, 0, 1, 1], [], []>} : vector<16x128xbf16>, vector<128x2xbf16>, vector<16x2xf32> -> vector<16x2xf32>
    %c0_9 = arith.constant 0 : index
    %c0_10 = arith.constant 0 : index
    %12 = vector.load %arg5[%c0_9, %c0_10] : memref<1x2xf32, #tpu.memory_space<vmem>>, vector<1x2xf32>
    %13 = vector.broadcast %12 : vector<1x2xf32> to vector<16x2xf32>
    %14 = arith.addf %11, %13 : vector<16x2xf32>
    %c0_11 = arith.constant 0 : index
    %c0_12 = arith.constant 0 : index
    %15 = vector.load %arg6[%c0_11, %c0_12] : memref<16x2xf32, #tpu.memory_space<vmem>>, vector<16x2xf32>
    tpu.vector_store %arg6[%c0_11, %c0_12], %14 {strides = array<i32>} : memref<16x2xf32, #tpu.memory_space<vmem>>, vector<16x2xf32>,
    return
  }
  func.func @transform_0(%arg0: i32) -> (i32, i32) {
    %c0_i32 = arith.constant 0 : i32
    %c0_i32_0 = arith.constant 0 : i32
    return %arg0, %c0_i32 : i32, i32
  }
  func.func @transform_1(%arg0: i32) -> (i32, i32) {
    %c0_i32 = arith.constant 0 : i32
    %c0_i32_0 = arith.constant 0 : i32
    %c0_i32_1 = arith.constant 0 : i32
    return %c0_i32, %c0_i32_0 : i32, i32
  }
  func.func @transform_2(%arg0: i32) -> (i32, i32) {
    %c0_i32 = arith.constant 0 : i32
    %c0_i32_0 = arith.constant 0 : i32
    %c0_i32_1 = arith.constant 0 : i32
    return %c0_i32, %c0_i32_0 : i32, i32
  }
  func.func @transform_3(%arg0: i32) -> (i32, i32) {
    %c0_i32 = arith.constant 0 : i32
    %c0_i32_0 = arith.constant 0 : i32
    %c0_i32_1 = arith.constant 0 : i32
    return %c0_i32, %c0_i32_0 : i32, i32
  }
  func.func @transform_4(%arg0: i32) -> (i32, i32) {
    %c0_i32 = arith.constant 0 : i32
    %c0_i32_0 = arith.constant 0 : i32
    %c0_i32_1 = arith.constant 0 : i32
    return %c0_i32, %c0_i32_0 : i32, i32
  }
  func.func @transform_5(%arg0: i32) -> (i32, i32) {
    %c0_i32 = arith.constant 0 : i32
    %c0_i32_0 = arith.constant 0 : i32
    return %arg0, %c0_i32 : i32, i32
  }
}

</mosaic_0001>

<bundles_post_ra>
// kernel: parametric_umap_forward.1
= control target key start
LH: loop header
LB: loop body
LE: loop exit
PB: predicated region body
PF: predicated region fallthrough
CT: control target
= control target key end

     0   :  { %vm44_vm0 = vcmask 261120   ;;  %vm147_vm1 = vcmask 15360   ;;  %s285_s1 = inlined_call_operand.vmem [shape: bf16[32,128], index: 1, kind: input, shape index: {}]   ;;  %s286_s0 = inlined_call_operand.vmem [shape: f32[16,32], index: 0, kind: input, shape index: {}]   ;;  %s287_s3 = inlined_call_operand.vmem [shape: bf16[128,2], index: 3, kind: input, shape index: {}]   ;;  %s288_s2 = inlined_call_operand.vmem [shape: f32[1,128], index: 2, kind: input, shape index: {}]   ;;  %s289_s4 = inlined_call_operand.vmem [shape: f32[1,2], index: 4, kind: input, shape index: {}]   ;;  %s290_s5 = inlined_call_operand.vmem [shape: f32[16,2], index: 5, kind: output, shape index: {}]  }
   0x1   :  { %v196_v0 = vld [vmem:[%s285_s1 + $0x8] sm:$0xff]  ;;  %v195_v1 = vld [vmem:[%s285_s1] sm:$0xff]  ;;  %v204_v2 = vld [vmem:[%s287_s3 + $0x38] sm:$0xff] }
   0x2   :  { %54 = vmatpush.bf16.msra.mxu0 %v196_v0  ;;  %v21_v3 = vld [vmem:[%s286_s0] sm:$0xff]  ;;  %v22_v4 = vld [vmem:[%s286_s0 + $0x8] sm:$0xff]  ;;  %133 = vmatpush.bf16.msra.mxu1 %v204_v2  ;;  %v203_v5 = vld [vmem:[%s287_s3 + $0x30] sm:$0xff] }
   0x3   :  { %v23_v6 = vpack.c.bf16 %v22_v4, %v21_v3  ;;  %v202_v7 = vld [vmem:[%s287_s3 + $0x28] sm:$0xff]  ;;  %v201_v8 = vld [vmem:[%s287_s3 + $0x20] sm:$0xff]  ;;  %v200_v9 = vld [vmem:[%s287_s3 + $0x18] sm:$0xff] }
   0x4   :  { %v199_v10 = vld [vmem:[%s287_s3 + $0x10] sm:$0xff]  ;;  %v198_v11 = vld [vmem:[%s287_s3 + $0x8] sm:$0xff]  ;;  %v197_v12 = vld [vmem:[%s287_s3] sm:$0xff] }
   0x5   :  { %v205_v14 = vld [vmem:[%s288_s2] ss:$0 sm:$0xff] }
   0x6   :  { %55 = vmatpush.bf16.msra.mxu0 %v195_v1  ;;  %134 = vmatpush.bf16.msra.mxu1 %v203_v5  ;;  %v206_v21 = vld [vmem:[%s289_s4] ss:$0 sm:$0xff] }
   0x9   :  { %162 = vmatmul.msk.bf16.vlgmr.msra.gmra.mxu0 %vm44_vm0, %v23_v6 }
   0xa   :  { %135 = vmatpush.bf16.msra.mxu1 %v202_v7 }
   0xe   :  { %136 = vmatpush.bf16.msra.mxu1 %v201_v8 }
  0x12   :  { %137 = vmatpush.bf16.msra.mxu1 %v200_v9 }
  0x16   :  { %138 = vmatpush.bf16.msra.mxu1 %v199_v10 }
  0x1a   :  { %139 = vmatpush.bf16.msra.mxu1 %v198_v11 }
  0x1e   :  { %140 = vmatpush.bf16.msra.mxu1 %v197_v12 }
  0x86   :  { %v57_v13 = vpop.f32.mrf.mxu0 }
  0x87   :  { %v58_v15 = vadd.f32 %v205_v14, %v57_v13 }
  0x89   :  { %v62_v18 = vmax.f32 %v58_v15, 0.0 }
  0x8e   :  { %v59_v16 = vpop.f32.mrf.mxu0 }
  0x8f   :  { %v60_v17 = vadd.f32 %v205_v14, %v59_v16 }
  0x91   :  { %v63_v19 = vmax.f32 %v60_v17, 0.0 }
  0x93   :  { %v64_v20 = vpack.c.bf16 %v63_v19, %v62_v18 }
  0x95   :  { %141 = vmatmul.bf16.vlgmr.msra.gmra.mxu1 %v64_v20 }
 0x112   :  { %v142_v22 = vpop.f32.mrf.mxu1 }
 0x113   :  { %v143_v23 = vadd.f32 %v206_v21, %v142_v22 }
 0x115   :  { %148 = vst.msk [vmem:[%s290_s5] sm:$0xff] %vm147_vm1, %v143_v23 }
 0x11a   :  { %v144_v24 = vpop.f32.mrf.mxu1 }
 0x11b   :  { %v145_v25 = vadd.f32 %v206_v21, %v144_v24 }
 0x11d   :  { %149 = vst.msk [vmem:[%s290_s5 + $0x8] sm:$0xff] %vm147_vm1, %v145_v25 }

</bundles_post_ra>
